<compile_context>
chip_gen: v7x
topology: tpu7x:2x2x1
jax: 0.10.0
libtpu: 0.0.40
codegen_flags: <defaults>
</compile_context>

<pallas_src>
import jax
import jax.numpy as jnp
from jax.experimental import pallas as pl
from jax.experimental.pallas import tpu as pltpu

LANE = 128  # TPU vreg lane width


def _round_up(n, m):
    return ((n + m - 1) // m) * m


def _default_epilogue_dtype():
    """bf16 epilogue on chips with bf16 VALUs (v6e/v7x), f32 elsewhere."""
    try:
        kind = jax.devices()[0].device_kind.lower()
    except Exception:
        return jnp.float32
    if "v6" in kind or "v7" in kind or "7x" in kind:
        return jnp.bfloat16
    return jnp.float32


def _pad2(a, rows, cols, dtype):
    buf = jnp.zeros((rows, cols), dtype)
    return buf.at[: a.shape[0], : a.shape[1]].set(a.astype(dtype))


def prepare_dqn_params(params, *, epilogue_dtype=None):
    """One-time prep: pad feature dims to lane multiples, cast weights to bf16.

    params layout is x @ W + b:  w1 (D_in, H), b1 (1, H), w2 (H, H), b2 (1, H),
    w3 (H, D_out), b3 (1, D_out).
    """
    if epilogue_dtype is None:
        epilogue_dtype = _default_epilogue_dtype()

    D_in, H = params["w1"].shape
    D_out = params["w3"].shape[1]
    H_p = _round_up(H, LANE)
    D_out_p = _round_up(D_out, LANE)

    return {
        # w1 keeps its real contraction dim D_in (matches the unpadded x
        # stream); block = full array, so no (8,128) constraint applies.
        "w1": _pad2(params["w1"], D_in, H_p, jnp.bfloat16),
        "b1": _pad2(params["b1"], 1, H_p, epilogue_dtype),
        "w2": _pad2(params["w2"], H_p, H_p, jnp.bfloat16),
        "b2": _pad2(params["b2"], 1, H_p, epilogue_dtype),
        "w3": _pad2(params["w3"], H_p, D_out_p, jnp.bfloat16),
        # b3 stays unpadded f32: the final bias-add happens after slicing the
        # matmul result down to the real D_out columns.
        "b3": params["b3"].reshape(1, D_out).astype(jnp.float32),
    }


def dqn_kernel(x_ref, w1_ref, b1_ref, w2_ref, b2_ref, w3_ref, b3_ref, o_ref):
    ep = b1_ref.dtype  # epilogue dtype: bf16 (v6e/v7x) or f32 (v5e)

    # Layer 1: cast the f32 x tile to bf16 for the MXU, accumulate in f32.
    x = x_ref[...].astype(jnp.bfloat16)
    h1 = jnp.dot(x, w1_ref[...], preferred_element_type=jnp.float32)
    h1 = jnp.maximum(h1.astype(ep) + b1_ref[...], 0).astype(jnp.bfloat16)

    # Layer 2.
    h2 = jnp.dot(h1, w2_ref[...], preferred_element_type=jnp.float32)
    h2 = jnp.maximum(h2.astype(ep) + b2_ref[...], 0).astype(jnp.bfloat16)

    # Output layer: lane-dense MXU feed (D_out padded to 128 inside w3), then
    # slice down to the real D_out columns so the HBM writeback is tiny.
    out = jnp.dot(h2, w3_ref[...], preferred_element_type=jnp.float32)
    d_out = o_ref.shape[1]
    o_ref[...] = (out[:, :d_out] + b3_ref[...]).astype(o_ref.dtype)


def _pick_tile(B):
    if B <= 512:
        return _round_up(B, 8)
    # >=4 steps of <=512 rows; even step count so both v7x TensorCores get work.
    steps = max(4, pl.cdiv(B, 512))
    if steps % 2:
        steps += 1
    return _round_up(pl.cdiv(B, steps), 8)


def dqn_forward(x, prepped, *, tb=None):
    """x: (B, D_in) float32. prepped: output of prepare_dqn_params()."""
    B, D_in = x.shape
    w1, b1, w2, b2, w3, b3 = (prepped[k] for k in ("w1", "b1", "w2", "b2", "w3", "b3"))
    assert w1.shape[0] == D_in, (w1.shape, D_in)
    H_p = w1.shape[1]
    D_out_p = w3.shape[1]
    D_out = b3.shape[1]

    # Batch tile (rows).  Multiple of 8 keeps the f32 x/out blocks legal.
    tb = _pick_tile(B) if tb is None else _round_up(max(tb, 8), 8)
    B_p = _round_up(B, tb)

    # Only the batch dim may need padding; feature dims stream unpadded.
    xp = x if B_p == B else jnp.zeros((B_p, D_in), x.dtype).at[:B].set(x)

    grid = (B_p // tb,)
    flops = 2 * B_p * (D_in * H_p + H_p * H_p + H_p * D_out_p)
    bytes_accessed = (
        B_p * D_in * 4                    # streamed x (f32)
        + B_p * D_out * 4                 # output writeback (f32)
        + (D_in * H_p + H_p * H_p + H_p * D_out_p) * 2   # bf16 weights
        + 2 * H_p * jnp.dtype(b1.dtype).itemsize + D_out * 4  # biases
    )

    out = pl.pallas_call(
        dqn_kernel,
        out_shape=jax.ShapeDtypeStruct((B_p, D_out), jnp.float32),
        grid_spec=pltpu.PrefetchScalarGridSpec(
            num_scalar_prefetch=0,
            grid=grid,
            in_specs=[
                pl.BlockSpec((tb, D_in), lambda i: (i, 0)),      # x tile (streamed, f32)
                pl.BlockSpec((D_in, H_p), lambda i: (0, 0)),     # w1 (resident)
                pl.BlockSpec((1, H_p), lambda i: (0, 0)),        # b1
                pl.BlockSpec((H_p, H_p), lambda i: (0, 0)),      # w2
                pl.BlockSpec((1, H_p), lambda i: (0, 0)),        # b2
                pl.BlockSpec((H_p, D_out_p), lambda i: (0, 0)),  # w3
                pl.BlockSpec((1, D_out), lambda i: (0, 0)),      # b3 (unpadded)
            ],
            out_specs=pl.BlockSpec((tb, D_out), lambda i: (i, 0)),
        ),
        compiler_params=pltpu.CompilerParams(
            dimension_semantics=("parallel",),
        ),
        cost_estimate=pl.CostEstimate(
            flops=flops, transcendentals=0, bytes_accessed=bytes_accessed),
    )(xp, w1, b1, w2, b2, w3, b3)

    # Strip batch padding only (feature dim is already exact).
    return out if B_p == B else out[:B]


def init_dqn_params(key, input_dim, hidden=64, output_dim=2):
    """Deterministic init mimicking nn.Linear's uniform(-1/sqrt(fan_in), ...)."""
    ks = jax.random.split(key, 6)

    def linear(kw, kb, fan_in, fan_out):
        bound = 1.0 / jnp.sqrt(fan_in)
        w = jax.random.uniform(kw, (fan_in, fan_out), jnp.float32, -bound, bound)
        b = jax.random.uniform(kb, (1, fan_out), jnp.float32, -bound, bound)
        return w, b

    w1, b1 = linear(ks[0], ks[1], input_dim, hidden)
    w2, b2 = linear(ks[2], ks[3], hidden, hidden)
    w3, b3 = linear(ks[4], ks[5], hidden, output_dim)
    return {"w1": w1, "b1": b1, "w2": w2, "b2": b2, "w3": w3, "b3": b3}


def dqn_reference(x, p):
    h1 = jnp.maximum(x @ p["w1"] + p["b1"], 0.0)
    h2 = jnp.maximum(h1 @ p["w2"] + p["b2"], 0.0)
    return h2 @ p["w3"] + p["b3"]


if __name__ == "__main__":
    key = jax.random.PRNGKey(0)
    k_params, k_x = jax.random.split(key)

    batch, input_dim, output_dim = 8, 32, 2
    params = init_dqn_params(k_params, input_dim, hidden=64, output_dim=output_dim)
    prepped = prepare_dqn_params(params)          # one-time prep (hoisted out of the call path)
    x = jax.random.normal(k_x, (batch, input_dim), jnp.float32)

    out = dqn_forward(x, prepped)
    out = jax.block_until_ready(out)

    ref = dqn_reference(x, params)
    assert out.shape == (batch, output_dim), out.shape
    # bf16 MXU operands -> loosened tolerance vs the f32 reference.
    assert jnp.allclose(out, ref, atol=3e-2, rtol=3e-2), "mismatch vs reference"

    print("KERNEL_OK")
</pallas_src>

<mosaic_0001>
module attributes {stable_mosaic.version = 11 : i64} {
  func.func @dqn_kernel(%arg0: i32, %arg1: memref<8x32xf32, #tpu.memory_space<vmem>>, %arg2: memref<32x128xbf16, #tpu.memory_space<vmem>>, %arg3: memref<1x128xf32, #tpu.memory_space<vmem>>, %arg4: memref<128x128xbf16, #tpu.memory_space<vmem>>, %arg5: memref<1x128xf32, #tpu.memory_space<vmem>>, %arg6: memref<128x128xbf16, #tpu.memory_space<vmem>>, %arg7: memref<1x2xf32, #tpu.memory_space<vmem>>, %arg8: memref<8x2xf32, #tpu.memory_space<vmem>>) attributes {dimension_semantics = [#tpu.dimension_semantics<parallel>], iteration_bounds = array<i64: 1>, scalar_prefetch = 0 : i64, scratch_operands = 0 : i64, tpu.core_type = #tpu.core_type<tc>, window_params = [{transform_indices = @transform_0, window_bounds = array<i64: 8, 32>}, {pipeline_mode = #tpu.pipeline_mode<synchronous>, transform_indices = @transform_1, window_bounds = array<i64: 32, 128>}, {pipeline_mode = #tpu.pipeline_mode<synchronous>, transform_indices = @transform_2, window_bounds = array<i64: 1, 128>}, {pipeline_mode = #tpu.pipeline_mode<synchronous>, transform_indices = @transform_3, window_bounds = array<i64: 128, 128>}, {pipeline_mode = #tpu.pipeline_mode<synchronous>, transform_indices = @transform_4, window_bounds = array<i64: 1, 128>}, {pipeline_mode = #tpu.pipeline_mode<synchronous>, transform_indices = @transform_5, window_bounds = array<i64: 128, 128>}, {pipeline_mode = #tpu.pipeline_mode<synchronous>, transform_indices = @transform_6, window_bounds = array<i64: 1, 2>}, {transform_indices = @transform_7, window_bounds = array<i64: 8, 2>}]} {
    %c0 = arith.constant 0 : index
    %c0_0 = arith.constant 0 : index
    %0 = vector.load %arg1[%c0, %c0_0] : memref<8x32xf32, #tpu.memory_space<vmem>>, vector<8x32xf32>
    %1 = arith.truncf %0 : vector<8x32xf32> to vector<8x32xbf16>
    %c0_1 = arith.constant 0 : index
    %c0_2 = arith.constant 0 : index
    %2 = vector.load %arg2[%c0_1, %c0_2] : memref<32x128xbf16, #tpu.memory_space<vmem>>, vector<32x128xbf16>
    %cst = arith.constant dense<0.000000e+00> : vector<8x128xf32>
    %3 = tpu.matmul %1, %2, %cst {dimension_numbers = #tpu.dot_dimension_numbers<[1], [0], [0], [1], [0, 0, 1, 1], [], []>} : vector<8x32xbf16>, vector<32x128xbf16>, vector<8x128xf32> -> vector<8x128xf32>
    %c0_3 = arith.constant 0 : index
    %c0_4 = arith.constant 0 : index
    %4 = vector.load %arg3[%c0_3, %c0_4] : memref<1x128xf32, #tpu.memory_space<vmem>>, vector<1x128xf32>
    %5 = vector.broadcast %4 : vector<1x128xf32> to vector<8x128xf32>
    %6 = arith.addf %3, %5 : vector<8x128xf32>
    %cst_5 = arith.constant 0.000000e+00 : f32
    %7 = vector.broadcast %cst_5 : f32 to vector<8x128xf32>
    %8 = arith.maximumf %6, %7 : vector<8x128xf32>
    %9 = arith.truncf %8 : vector<8x128xf32> to vector<8x128xbf16>
    %c0_6 = arith.constant 0 : index
    %c0_7 = arith.constant 0 : index
    %10 = vector.load %arg4[%c0_6, %c0_7] : memref<128x128xbf16, #tpu.memory_space<vmem>>, vector<128x128xbf16>
    %cst_8 = arith.constant dense<0.000000e+00> : vector<8x128xf32>
    %11 = tpu.matmul %9, %10, %cst_8 {dimension_numbers = #tpu.dot_dimension_numbers<[1], [0], [0], [1], [0, 0, 1, 1], [], []>} : vector<8x128xbf16>, vector<128x128xbf16>, vector<8x128xf32> -> vector<8x128xf32>
    %c0_9 = arith.constant 0 : index
    %c0_10 = arith.constant 0 : index
    %12 = vector.load %arg5[%c0_9, %c0_10] : memref<1x128xf32, #tpu.memory_space<vmem>>, vector<1x128xf32>
    %13 = vector.broadcast %12 : vector<1x128xf32> to vector<8x128xf32>
    %14 = arith.addf %11, %13 : vector<8x128xf32>
    %cst_11 = arith.constant 0.000000e+00 : f32
    %15 = vector.broadcast %cst_11 : f32 to vector<8x128xf32>
    %16 = arith.maximumf %14, %15 : vector<8x128xf32>
    %17 = arith.truncf %16 : vector<8x128xf32> to vector<8x128xbf16>
    %c0_12 = arith.constant 0 : index
    %c0_13 = arith.constant 0 : index
    %18 = vector.load %arg6[%c0_12, %c0_13] : memref<128x128xbf16, #tpu.memory_space<vmem>>, vector<128x128xbf16>
    %cst_14 = arith.constant dense<0.000000e+00> : vector<8x128xf32>
    %19 = tpu.matmul %17, %18, %cst_14 {dimension_numbers = #tpu.dot_dimension_numbers<[1], [0], [0], [1], [0, 0, 1, 1], [], []>} : vector<8x128xbf16>, vector<128x128xbf16>, vector<8x128xf32> -> vector<8x128xf32>
    %20 = vector.extract_strided_slice %19 {offsets = [0, 0], sizes = [8, 2], strides = [1, 1]} : vector<8x128xf32> to vector<8x2xf32>
    %c0_15 = arith.constant 0 : index
    %c0_16 = arith.constant 0 : index
    %21 = vector.load %arg7[%c0_15, %c0_16] : memref<1x2xf32, #tpu.memory_space<vmem>>, vector<1x2xf32>
    %22 = vector.broadcast %21 : vector<1x2xf32> to vector<8x2xf32>
    %23 = arith.addf %20, %22 : vector<8x2xf32>
    %c0_17 = arith.constant 0 : index
    %c0_18 = arith.constant 0 : index
    %24 = vector.load %arg8[%c0_17, %c0_18] : memref<8x2xf32, #tpu.memory_space<vmem>>, vector<8x2xf32>
    tpu.vector_store %arg8[%c0_17, %c0_18], %23 {strides = array<i32>} : memref<8x2xf32, #tpu.memory_space<vmem>>, vector<8x2xf32>,
    return
  }
  func.func @transform_0(%arg0: i32) -> (i32, i32) {
    %c0_i32 = arith.constant 0 : i32
    %c0_i32_0 = arith.constant 0 : i32
    return %arg0, %c0_i32 : i32, i32
  }
  func.func @transform_1(%arg0: i32) -> (i32, i32) {
    %c0_i32 = arith.constant 0 : i32
    %c0_i32_0 = arith.constant 0 : i32
    %c0_i32_1 = arith.constant 0 : i32
    return %c0_i32, %c0_i32_0 : i32, i32
  }
  func.func @transform_2(%arg0: i32) -> (i32, i32) {
    %c0_i32 = arith.constant 0 : i32
    %c0_i32_0 = arith.constant 0 : i32
    %c0_i32_1 = arith.constant 0 : i32
    return %c0_i32, %c0_i32_0 : i32, i32
  }
  func.func @transform_3(%arg0: i32) -> (i32, i32) {
    %c0_i32 = arith.constant 0 : i32
    %c0_i32_0 = arith.constant 0 : i32
    %c0_i32_1 = arith.constant 0 : i32
    return %c0_i32, %c0_i32_0 : i32, i32
  }
  func.func @transform_4(%arg0: i32) -> (i32, i32) {
    %c0_i32 = arith.constant 0 : i32
    %c0_i32_0 = arith.constant 0 : i32
    %c0_i32_1 = arith.constant 0 : i32
    return %c0_i32, %c0_i32_0 : i32, i32
  }
  func.func @transform_5(%arg0: i32) -> (i32, i32) {
    %c0_i32 = arith.constant 0 : i32
    %c0_i32_0 = arith.constant 0 : i32
    %c0_i32_1 = arith.constant 0 : i32
    return %c0_i32, %c0_i32_0 : i32, i32
  }
  func.func @transform_6(%arg0: i32) -> (i32, i32) {
    %c0_i32 = arith.constant 0 : i32
    %c0_i32_0 = arith.constant 0 : i32
    %c0_i32_1 = arith.constant 0 : i32
    return %c0_i32, %c0_i32_0 : i32, i32
  }
  func.func @transform_7(%arg0: i32) -> (i32, i32) {
    %c0_i32 = arith.constant 0 : i32
    %c0_i32_0 = arith.constant 0 : i32
    return %arg0, %c0_i32 : i32, i32
  }
}

</mosaic_0001>

<bundles_post_ra>
// kernel: tpu_custom_call.1
= control target key start
LH: loop header
LB: loop body
LE: loop exit
PB: predicated region body
PF: predicated region fallthrough
CT: control target
= control target key end

     0   :  { %12 = vsyncpa [#allocation3], 0  ;;  %s737_s0 = inlined_call_operand.hbm [shape: f32[8,32], index: 0, kind: input, shape index: {}]   ;;  %s738_s1 = inlined_call_operand.hbm [shape: bf16[32,128], index: 1, kind: input, shape index: {}]   ;;  %s739_s2 = inlined_call_operand.vmem [shape: f32[1,128], index: 2, kind: input, shape index: {}]   ;;  %s740_s3 = inlined_call_operand.hbm [shape: bf16[128,128], index: 3, kind: input, shape index: {}]   ;;  %s741_s4 = inlined_call_operand.vmem [shape: f32[1,128], index: 4, kind: input, shape index: {}]   ;;  %s742_s5 = inlined_call_operand.hbm [shape: bf16[128,128], index: 5, kind: input, shape index: {}]   ;;  %s743_s6 = inlined_call_operand.vmem [shape: f32[1,2], index: 6, kind: input, shape index: {}]   ;;  %s744_s7 = inlined_call_operand.vmem [shape: f32[8,2], index: 7, kind: output, shape index: {}]  }
   0x1   :  { %13 = vsyncpa [#allocation5], 0 }
   0x2   :  { %14 = vsyncpa [#allocation8], 0  ;;  %s596_s24 = smov [#allocation4]   ;;  %s502_s28 = scalar_lea.hbm %s738_s1, 256 }
   0x3   :  { %s30_s25 = sshll.u32 %s596_s24, 4  ;;  %p503_p0 = scmp.ne.s32.totalorder %s738_s1, %s502_s28  ;;  %s31_s25 = int_to_ptr.vmem [resolvable:$true] %s30_s25 }
   0x4   :  { %p506_p1 = scmp.lt.u32.totalorder %s502_s28, %s738_s1 }
   0x6   :  { %p508_p2 = pnand %p506_p1, %p503_p0 }
   0x8   :  { %511 = shalt.err (!%p508_p2)
}
   0x9   :  { %s512_s10 = scalar_lea.vmem %s31_s25, 256  ;;  %p517_p4 = scmp.lt.s32.totalorder %s31_s25, %s31_s25 }
   0xa   :  { %p513_p3 = scmp.ne.s32.totalorder %s31_s25, %s512_s10  ;;  %p518_p5 = scmp.lt.s32.totalorder %s512_s10, %s512_s10 }
   0xc   :  { %p519_p6 = por %p518_p5, %p517_p4 }
   0xe   :  { %p520_p7 = pnand %p519_p6, %p513_p3 }
  0x10   :  { %523 = shalt.err (!%p520_p7)
}
  0x11   :  { %s597_s11 = smov 64   ;;  %s598_s12 = smov 4  }
  0x12   :  { %36 = dma.hbm_to_vmem [thread:$0]  %s738_s1, 256, %s31_s25, [#allocation5], %s597_s11, %s597_s11, %s598_s12  }
  0x13   :  { %s599_s15 = smov [#allocation2]   ;;  %s600_s17 = smov [#allocation6]  }
  0x14   :  { %s21_s16 = sshll.u32 %s599_s15, 4  ;;  %s44_s18 = sshll.u32 %s600_s17, 4  ;;  %s22_s16 = int_to_ptr.vmem [resolvable:$true] %s21_s16  ;;  %s45_s18 = int_to_ptr.vmem [resolvable:$true] %s44_s18 }
  0x15   :  { %s524_s21 = scalar_lea.hbm %s737_s0, 128 }
  0x16   :  { %p525_p8 = scmp.ne.s32.totalorder %s737_s0, %s524_s21  ;;  %p528_p9 = scmp.lt.u32.totalorder %s524_s21, %s737_s0 }
  0x18   :  { %p530_p10 = pnand %p528_p9, %p525_p8 }
  0x1a   :  { %533 = shalt.err (!%p530_p10)
}
  0x1b   :  { %s534_s1 = scalar_lea.vmem %s22_s16, 128  ;;  %p539_p12 = scmp.lt.s32.totalorder %s22_s16, %s22_s16 }
  0x1c   :  { %p535_p11 = scmp.ne.s32.totalorder %s22_s16, %s534_s1  ;;  %p540_p13 = scmp.lt.s32.totalorder %s534_s1, %s534_s1 }
  0x1e   :  { %p541_p0 = por %p540_p13, %p539_p12 }
  0x20   :  { %p542_p1 = pnand %p541_p0, %p535_p11 }
  0x22   :  { %545 = shalt.err (!%p542_p1)
}
  0x23   :  { %24 = dma.hbm_to_vmem [thread:$0]  %s737_s0, 128, %s22_s16, [#allocation3]  }
  0x24   :  { %s546_s30 = scalar_lea.hbm %s740_s3, 1024 }
  0x25   :  { %p547_p2 = scmp.ne.s32.totalorder %s740_s3, %s546_s30  ;;  %p550_p3 = scmp.lt.u32.totalorder %s546_s30, %s740_s3 }
  0x27   :  { %p552_p4 = pnand %p550_p3, %p547_p2 }
  0x29   :  { %555 = shalt.err (!%p552_p4)
}
  0x2a   :  { %s556_s14 = scalar_lea.vmem %s45_s18, 1024  ;;  %p561_p6 = scmp.lt.s32.totalorder %s45_s18, %s45_s18 }
  0x2b   :  { %p557_p5 = scmp.ne.s32.totalorder %s45_s18, %s556_s14  ;;  %p562_p7 = scmp.lt.s32.totalorder %s556_s14, %s556_s14 }
  0x2d   :  { %p563_p8 = por %p562_p7, %p561_p6 }
  0x2f   :  { %p564_p9 = pnand %p563_p8, %p557_p5 }
  0x31   :  { %567 = shalt.err (!%p564_p9)
}
  0x32   :  { %50 = dma.hbm_to_vmem [thread:$0]  %s740_s3, 1024, %s45_s18, [#allocation5], %s597_s11, %s597_s11, %s598_s12  }
  0x33   :  { %s601_s16 = smov [#allocation7]   ;;  %s568_s21 = scalar_lea.hbm %s742_s5, 1024 }
  0x34   :  { %s58_s17 = sshll.u32 %s601_s16, 4  ;;  %p569_p10 = scmp.ne.s32.totalorder %s742_s5, %s568_s21  ;;  %s59_s17 = int_to_ptr.vmem [resolvable:$true] %s58_s17 }
  0x35   :  { %p572_p11 = scmp.lt.u32.totalorder %s568_s21, %s742_s5 }
  0x37   :  { %p574_p12 = pnand %p572_p11, %p569_p10 }
  0x39   :  { %577 = shalt.err (!%p574_p12)
}
  0x3a   :  { %s578_s1 = scalar_lea.vmem %s59_s17, 1024  ;;  %p583_p0 = scmp.lt.s32.totalorder %s59_s17, %s59_s17 }
  0x3b   :  { %p579_p13 = scmp.ne.s32.totalorder %s59_s17, %s578_s1  ;;  %p584_p1 = scmp.lt.s32.totalorder %s578_s1, %s578_s1 }
  0x3d   :  { %p585_p2 = por %p584_p1, %p583_p0 }
  0x3f   :  { %p586_p3 = pnand %p585_p2, %p579_p13 }
  0x41   :  { %589 = shalt.err (!%p586_p3)
}
  0x42   :  { %64 = dma.hbm_to_vmem [thread:$0]  %s742_s5, 1024, %s59_s17, [#allocation8], %s597_s11, %s597_s11, %s598_s12  }
  0x43   :  { %590 = dma.done.wait [#allocation3], 128  }
  0x44   :  { %591 = vsyncadd [#allocation3], 4294967168 }
  0x45   :  { %592 = dma.done.wait [#allocation5], 1280  }
  0x46   :  { %593 = vsyncadd [#allocation5], 4294966016 }
  0x47   :  { %594 = dma.done.wait [#allocation8], 1024  }
  0x48   :  { %595 = vsyncadd [#allocation8], 4294966272  ;;  %v602_v0 = vmov 0.0   ;;  %vm603_vm0 = vmmov 0   ;;  %v484_v1 = vld [vmem:[#allocation4] sm:$0xff]   ;;  %v485_v2 = vld [vmem:[#allocation4 + $0x8] sm:$0xff]  }
  0x49   :  { %428 = vmatprep.subr.bf16.mxu0 %v602_v0  ;;  %432 = vmatprep.mubr.msk.bf16.mxu0 %vm603_vm0, %v602_v0  ;;  %v80_v3 = vld [vmem:[#allocation2] sm:$0xff]  ;;  %v486_v4 = vld [vmem:[#allocation6] sm:$0xff]   ;;  %vm105_vm1 = vcmask 261120   ;;  %v488_v7 = vld [vmem:[#allocation6 + $0x10] sm:$0xff]   ;;  %vm376_vm2 = vcmask 15360  }
  0x4a   :  { %436 = vmatprep.subr.bf16.mxu1 %v602_v0  ;;  %452 = vmatprep.mubr.msk.bf16.mxu1 %vm603_vm0, %v602_v0  ;;  %v81_v5 = vpack.c.bf16 %v80_v3, %v80_v3  ;;  %v487_v6 = vld [vmem:[#allocation6 + $0x8] sm:$0xff]   ;;  %v489_v8 = vld [vmem:[#allocation6 + $0x18] sm:$0xff]   ;;  %v490_v9 = vld [vmem:[#allocation6 + $0x20] sm:$0xff]  }
  0x4b   :  { %429 = vmatpush3.bf16.msra.mxu0 %v484_v1  ;;  %437 = vmatpush3.bf16.msra.mxu1 %v486_v4  ;;  %v491_v10 = vld [vmem:[#allocation6 + $0x28] sm:$0xff]   ;;  %v492_v11 = vld [vmem:[#allocation6 + $0x30] sm:$0xff]   ;;  %v493_v12 = vld [vmem:[#allocation6 + $0x38] sm:$0xff]  }
  0x4c   :  { %430 = vmatprep.subr.bf16.mxu0 %v602_v0  ;;  %438 = vmatprep.subr.bf16.mxu1 %v602_v0  ;;  %v494_v13 = vld [vmem:[#allocation7] sm:$0xff]   ;;  %v495_v14 = vld [vmem:[#allocation7 + $0x8] sm:$0xff]   ;;  %v496_v15 = vld [vmem:[#allocation7 + $0x10] sm:$0xff]  }
  0x4d   :  { %v497_v16 = vld [vmem:[#allocation7 + $0x18] sm:$0xff]   ;;  %v498_v17 = vld [vmem:[#allocation7 + $0x20] sm:$0xff]   ;;  %v499_v18 = vld [vmem:[#allocation7 + $0x28] sm:$0xff]  }
  0x4e   :  { %v385_v19 = vld [vmem:[%s739_s2] ss:$0 sm:$0xff]  ;;  %v500_v27 = vld [vmem:[#allocation7 + $0x30] sm:$0xff]   ;;  %v501_v28 = vld [vmem:[#allocation7 + $0x38] sm:$0xff]  }
  0x4f   :  { %431 = vmatpush3.bf16.msra.mxu0 %v485_v2  ;;  %439 = vmatpush3.bf16.msra.mxu1 %v487_v6  ;;  %v389_v29 = vld [vmem:[%s741_s4] ss:$0 sm:$0xff] }
  0x50   :  { %456 = vmatprep.subr.bf16.mxu0 %v602_v0  ;;  %440 = vmatprep.subr.bf16.mxu1 %v602_v0  ;;  %v406_v37 = vld [vmem:[%s743_s6] ss:$0 sm:$0xff] }
  0x52   :  { %433 = vmatmul.mubr.msk.bf16.vlgmr.msra.gmra.mrb[0].mxu0 %vm105_vm1, %v81_v5 }
  0x53   :  { %472 = vmatprep.mubr.msk.bf16.mxu0 %vm603_vm0, %v602_v0  ;;  %441 = vmatpush3.bf16.msra.mxu1 %v488_v7 }
  0x54   :  { %442 = vmatprep.subr.bf16.mxu1 %v602_v0  ;;  %457 = vmatpush3.bf16.msra.mxu0 %v494_v13 }
  0x55   :  { %458 = vmatprep.subr.bf16.mxu0 %v602_v0 }
  0x57   :  { %443 = vmatpush3.bf16.msra.mxu1 %v489_v8 }
  0x58   :  { %444 = vmatprep.subr.bf16.mxu1 %v602_v0  ;;  %459 = vmatpush3.bf16.msra.mxu0 %v495_v14 }
  0x59   :  { %460 = vmatprep.subr.bf16.mxu0 %v602_v0 }
  0x5b   :  { %445 = vmatpush3.bf16.msra.mxu1 %v490_v9 }
  0x5c   :  { %446 = vmatprep.subr.bf16.mxu1 %v602_v0  ;;  %461 = vmatpush3.bf16.msra.mxu0 %v496_v15 }
  0x5d   :  { %462 = vmatprep.subr.bf16.mxu0 %v602_v0 }
  0x5f   :  { %447 = vmatpush3.bf16.msra.mxu1 %v491_v10 }
  0x60   :  { %448 = vmatprep.subr.bf16.mxu1 %v602_v0  ;;  %463 = vmatpush3.bf16.msra.mxu0 %v497_v16 }
  0x61   :  { %464 = vmatprep.subr.bf16.mxu0 %v602_v0 }
  0x63   :  { %449 = vmatpush3.bf16.msra.mxu1 %v492_v11 }
  0x64   :  { %450 = vmatprep.subr.bf16.mxu1 %v602_v0  ;;  %465 = vmatpush3.bf16.msra.mxu0 %v498_v17 }
  0x65   :  { %466 = vmatprep.subr.bf16.mxu0 %v602_v0 }
  0x67   :  { %451 = vmatpush3.bf16.msra.mxu1 %v493_v12 }
  0x68   :  { %467 = vmatpush3.bf16.msra.mxu0 %v499_v18 }
  0x69   :  { %468 = vmatprep.subr.bf16.mxu0 %v602_v0 }
  0x6c   :  { %469 = vmatpush3.bf16.msra.mxu0 %v500_v27 }
  0x6d   :  { %470 = vmatprep.subr.bf16.mxu0 %v602_v0 }
  0x70   :  { %471 = vmatpush3.bf16.msra.mxu0 %v501_v28 }
 0x125   :  { %v143_v20 = vpop.f32.mrb[0].mxu0 }
 0x126   :  { %v144_v21 = vadd.f32 %v385_v19, %v143_v20  ;;  %v434_v22 = vpop.f32.mrb[1].mxu0 }
 0x127   :  { %v146_v23 = vpop.f32.mrb[2].mxu0 }
 0x128   :  { %v149_v24 = vmax.f32 %v144_v21, 0.0  ;;  %v435_v25 = vpop.f32.mrb[3].mxu0 }
 0x12a   :  { %v150_v26 = vpack.c.bf16 %v149_v24, %v149_v24 }
 0x12c   :  { %453 = vmatmul.mubr.bf16.vlgmr.msra.gmra.mrb[0].mxu1 %v150_v26 }
 0x1ff   :  { %v256_v30 = vpop.f32.mrb[0].mxu1 }
 0x200   :  { %v257_v31 = vadd.f32 %v389_v29, %v256_v30  ;;  %v454_v32 = vpop.f32.mrb[1].mxu1 }
 0x201   :  { %v259_v33 = vpop.f32.mrb[2].mxu1 }
 0x202   :  { %v262_v34 = vmax.f32 %v257_v31, 0.0  ;;  %v455_v35 = vpop.f32.mrb[3].mxu1 }
 0x204   :  { %v263_v36 = vpack.c.bf16 %v262_v34, %v262_v34 }
 0x206   :  { %473 = vmatmul.mubr.bf16.vlgmr.msra.gmra.mrb[4].mxu0 %v263_v36 }
 0x2d9   :  { %v362_v38 = vpop.f32.mrb[4].mxu0 }
 0x2da   :  { %v375_v39 = vadd.f32 %v406_v37, %v362_v38  ;;  %v474_v40 = vpop.f32.mrb[5].mxu0 }
 0x2db   :  { %v365_v41 = vpop.f32.mrb[6].mxu0 }
 0x2dc   :  { %377 = vst.msk [vmem:[%s744_s7] sm:$0xff] %vm376_vm2, %v375_v39  ;;  %v475_v42 = vpop.f32.mrb[7].mxu0 }
 0x2dd   :  { %382 = vsyncpa [#allocation3], 1 }
 0x2de   :  { %383 = vsyncpa [#allocation5], 1 }
 0x2df   :  { %384 = vsyncpa [#allocation8], 1 }

</bundles_post_ra>
